<compile_context>
chip_gen: v6e
topology: v6e:2x2x1
jax: 0.10.0
libtpu: 0.0.40
codegen_flags: <defaults>
</compile_context>

<pallas_src>
import functools

import jax
import jax.numpy as jnp
from jax import lax
from jax.experimental import pallas as pl
from jax.experimental.pallas import tpu as pltpu


# ----------------------------------------------------------------------------
# hardware / tiling helpers
# ----------------------------------------------------------------------------
def _round_up(x, m):
    return (x + m - 1) // m * m


def _vmem_capacity_bytes():
    """Physical VMEM of this generation (v7x: 64 MiB, v5e/v6e: 128 MiB)."""
    try:
        return int(pltpu.get_tpu_info().vmem_capacity_bytes)
    except Exception:
        return 64 << 20          # conservative fallback: fits every generation


def _choose_tk(AB, itemsize, capacity):
    """K tile: multiple of 128 lanes.  Per-buffer budget scales with VMEM
    capacity (~5 MiB on v7x, ~10 MiB on v5e/v6e) so each double-buffered
    feature DMA is >= 1-2 MiB and per-grid-step overhead stays hidden."""
    per_buffer = min(max(capacity // 12, 4 << 20), 16 << 20)
    tk = (per_buffer // max(1, AB * itemsize)) // 128 * 128
    return int(max(128, min(8192, tk)))


def _vmem_limit(AB, tk, itemsize, has_target, capacity):
    """Scoped-VMEM request, clamped below physical capacity per generation."""
    need = 2 * AB * tk * itemsize            # double-buffered feature stream
    need += 2 * AB * AB * 4                  # resident f32 gram output (x2 slack)
    if has_target:
        need += AB * AB * 4                  # resident single-buffered target
    need += 4 << 20                          # headroom
    cap = int(capacity * 0.85)               # ~54 MiB on v7x, ~108 MiB on v5e/v6e
    return int(min(max(need, 16 << 20), cap))


def _prep_features(x, tk, stream_dtype):
    """NCHW -> (AB, CD) row-major view (matches torch .view) + K-tile choice.

    No jnp.pad copy: ragged tails (CD % tk != 0) are zero-masked in-kernel.
    """
    a, b, c, d = x.shape
    AB, CD = a * b, c * d
    feats = x.reshape(AB, CD)
    if stream_dtype is not None and feats.dtype != jnp.dtype(stream_dtype):
        feats = feats.astype(stream_dtype)   # opt-in bf16 stream; accum stays f32
    itemsize = jnp.dtype(feats.dtype).itemsize
    capacity = _vmem_capacity_bytes()
    if CD < 128:
        tk_eff = CD                          # single full-width block, no tail
    else:
        tk_cap = (CD // 128) * 128           # keep block windows inside the array width
        tk_eff = _choose_tk(AB, itemsize, capacity) if tk is None \
            else max(128, _round_up(int(tk), 128))
        tk_eff = min(tk_eff, tk_cap)
    nk = pl.cdiv(CD, tk_eff)
    tail = CD % tk_eff                       # 0 => no masking needed
    return feats, AB, CD, tk_eff, nk, tail, itemsize, capacity


def _resident_spec(shape):
    """Block whose index never changes: single-buffer it when supported
    (saves AB^2*4 bytes of dead double-buffer VMEM)."""
    try:
        return pl.BlockSpec(shape, lambda k: (0, 0), pipeline_mode=pl.Buffered(1))
    except Exception:
        return pl.BlockSpec(shape, lambda k: (0, 0))


# ----------------------------------------------------------------------------
# kernels
# ----------------------------------------------------------------------------
def _accumulate_gram(feat_ref, g_ref, k, nk, tail):
    f = feat_ref[...]                                     # (AB, tk), native dtype
    if tail:                                              # static: ragged last block
        col = lax.broadcasted_iota(jnp.int32, f.shape, 1)
        keep = jnp.logical_or(k < nk - 1, col < tail)
        f = jnp.where(keep, f, jnp.zeros_like(f))
    # Contract both operands on their last (lane) axis -> MXU-native F @ F^T
    # (trans_b matmul; no per-step XLU transpose of the tile).
    g_ref[...] += lax.dot_general(
        f, f,
        dimension_numbers=(((1,), (1,)), ((), ())),
        preferred_element_type=jnp.float32,
    )


def _gram_kernel(feat_ref, g_ref, *, inv_norm, tail):
    k = pl.program_id(0)
    nk = pl.num_programs(0)

    @pl.when(k == 0)
    def _init():
        g_ref[...] = jnp.zeros_like(g_ref)

    _accumulate_gram(feat_ref, g_ref, k, nk, tail)

    @pl.when(k == nk - 1)
    def _finalize():
        g_ref[...] = g_ref[...] * inv_norm


def _style_loss_kernel(feat_ref, target_ref, g_ref, loss_ref, *,
                       inv_norm, inv_nsq, tail):
    k = pl.program_id(0)
    nk = pl.num_programs(0)

    @pl.when(k == 0)
    def _init():
        g_ref[...] = jnp.zeros_like(g_ref)

    _accumulate_gram(feat_ref, g_ref, k, nk, tail)

    @pl.when(k == nk - 1)
    def _finalize():
        g = g_ref[...] * inv_norm
        g_ref[...] = g
        diff = g - target_ref[...]
        loss_ref[0] = jnp.sum(diff * diff) * inv_nsq      # mean MSE -> SMEM scalar


# ----------------------------------------------------------------------------
# wrappers
# ----------------------------------------------------------------------------
def gram_matrix(x, *, tk=None, stream_dtype=None):
    a, b, c, d = x.shape
    feats, AB, CD, tk, nk, tail, itemsize, capacity = _prep_features(
        x, tk, stream_dtype)
    inv_norm = 1.0 / float(a * b * c * d)
    cost = pl.CostEstimate(
        flops=int(2 * AB * AB * CD),
        transcendentals=0,
        bytes_accessed=int(AB * CD * itemsize + AB * AB * 4),
    )
    return pl.pallas_call(
        functools.partial(_gram_kernel, inv_norm=inv_norm, tail=tail),
        out_shape=jax.ShapeDtypeStruct((AB, AB), jnp.float32),
        grid_spec=pltpu.PrefetchScalarGridSpec(
            num_scalar_prefetch=0,
            grid=(nk,),
            in_specs=[pl.BlockSpec((AB, tk), lambda k: (0, k))],
            out_specs=pl.BlockSpec((AB, AB), lambda k: (0, 0)),
        ),
        compiler_params=pltpu.CompilerParams(
            dimension_semantics=("arbitrary",),
            vmem_limit_bytes=_vmem_limit(AB, tk, itemsize, False, capacity),
        ),
        cost_estimate=cost,
    )(feats)


class StyleLoss:
    """JAX/Pallas equivalent of the PyTorch StyleLoss module (forward only)."""

    def __init__(self, target_feature, *, tk=None, stream_dtype=None):
        # target gram is fixed ("detached") at construction time
        self.target = gram_matrix(target_feature, tk=tk, stream_dtype=stream_dtype)
        self._tk = tk
        self._stream_dtype = stream_dtype
        self.loss = None
        self.gram = None

    def __call__(self, x):
        a, b, c, d = x.shape
        feats, AB, CD, tk, nk, tail, itemsize, capacity = _prep_features(
            x, self._tk, self._stream_dtype)
        assert self.target.shape == (AB, AB), "feature channel/batch mismatch"
        inv_norm = 1.0 / float(a * b * c * d)
        inv_nsq = 1.0 / float(AB * AB)
        cost = pl.CostEstimate(
            flops=int(2 * AB * AB * CD),
            transcendentals=0,
            bytes_accessed=int(AB * CD * itemsize + 2 * AB * AB * 4),
        )
        G, loss = pl.pallas_call(
            functools.partial(_style_loss_kernel, inv_norm=inv_norm,
                              inv_nsq=inv_nsq, tail=tail),
            out_shape=(
                jax.ShapeDtypeStruct((AB, AB), jnp.float32),
                jax.ShapeDtypeStruct((1,), jnp.float32),
            ),
            grid_spec=pltpu.PrefetchScalarGridSpec(
                num_scalar_prefetch=0,
                grid=(nk,),
                in_specs=[
                    pl.BlockSpec((AB, tk), lambda k: (0, k)),     # feature stream
                    _resident_spec((AB, AB)),                     # resident target
                ],
                out_specs=(
                    pl.BlockSpec((AB, AB), lambda k: (0, 0)),     # gram (resident)
                    pl.BlockSpec(memory_space=pltpu.MemorySpace.SMEM),  # scalar loss
                ),
            ),
            compiler_params=pltpu.CompilerParams(
                dimension_semantics=("arbitrary",),
                vmem_limit_bytes=_vmem_limit(AB, tk, itemsize, True, capacity),
            ),
            cost_estimate=cost,
        )(feats, self.target)
        self.loss = loss[0]
        self.gram = G
        return x  # same as PyTorch: forward returns its input unchanged


# ----------------------------------------------------------------------------
# Pure-JAX reference for verification
# ----------------------------------------------------------------------------
def _gram_ref(x):
    a, b, c, d = x.shape
    f = x.reshape(a * b, c * d).astype(jnp.float32)
    return (f @ f.T) / float(a * b * c * d)


if __name__ == "__main__":
    key = jax.random.PRNGKey(0)
    k1, k2, k3, k4 = jax.random.split(key, 4)

    # --- case 1: small NCHW (batch=2, channels=4, 16x16); auto tile -> nk=1 ---
    tgt1 = jax.random.normal(k1, (2, 4, 16, 16), dtype=jnp.float32)
    x1 = jax.random.normal(k2, (2, 4, 16, 16), dtype=jnp.float32)
    m1 = StyleLoss(tgt1)
    out1 = jax.block_until_ready(m1(x1))
    loss1 = jax.block_until_ready(m1.loss)
    G1_ref = _gram_ref(x1)
    loss1_ref = jnp.mean((G1_ref - _gram_ref(tgt1)) ** 2)
    assert out1.shape == x1.shape
    assert jnp.allclose(out1, x1)                                   # passthrough
    assert jnp.allclose(m1.gram, G1_ref, atol=1e-5, rtol=1e-5)
    assert jnp.allclose(loss1, loss1_ref, atol=1e-5, rtol=1e-5)

    # --- case 2: forced tk=128 -> multi-step K accumulation, CD=240 is ragged
    #     (exercises the in-kernel tail mask; no wrapper jnp.pad copy) ---
    tgt2 = jax.random.normal(k3, (2, 3, 12, 20), dtype=jnp.float32)  # AB=6, CD=240
    x2 = jax.random.normal(k4, (2, 3, 12, 20), dtype=jnp.float32)
    m2 = StyleLoss(tgt2, tk=128)
    out2 = jax.block_until_ready(m2(x2))
    loss2 = jax.block_until_ready(m2.loss)
    G2_ref = _gram_ref(x2)
    loss2_ref = jnp.mean((G2_ref - _gram_ref(tgt2)) ** 2)
    assert jnp.allclose(out2, x2)
    assert jnp.allclose(m2.gram, G2_ref, atol=1e-5, rtol=1e-5)
    assert jnp.allclose(loss2, loss2_ref, atol=1e-5, rtol=1e-5)

    # --- case 3: opt-in bf16 feature streaming (f32 accumulation).  Compare
    #     against a reference whose features are bf16-rounded identically. ---
    G3 = jax.block_until_ready(gram_matrix(x1, stream_dtype=jnp.bfloat16))
    G3_ref = _gram_ref(x1.astype(jnp.bfloat16).astype(jnp.float32))
    assert jnp.allclose(G3, G3_ref, atol=1e-4, rtol=1e-4)

    print("KERNEL_OK")
</pallas_src>

<mosaic_0001>
module attributes {stable_mosaic.version = 11 : i64} {
  func.func @_gram_kernel(%arg0: i32, %arg1: memref<8x256xf32, #tpu.memory_space<vmem>>, %arg2: memref<8x8xf32, #tpu.memory_space<vmem>>) attributes {dimension_semantics = [#tpu.dimension_semantics<arbitrary>], iteration_bounds = array<i64: 1>, scalar_prefetch = 0 : i64, scratch_operands = 0 : i64, tpu.core_type = #tpu.core_type<tc>, window_params = [{transform_indices = @transform_0, window_bounds = array<i64: 8, 256>}, {pipeline_mode = #tpu.pipeline_mode<synchronous>, transform_indices = @transform_1, window_bounds = array<i64: 8, 8>}]} {
    %c0_i32 = arith.constant 0 : i32
    %0 = arith.cmpi eq, %arg0, %c0_i32 : i32
    %1 = arith.extui %0 : i1 to i32
    %c0_i32_0 = arith.constant 0 : i32
    %2 = arith.cmpi ne, %1, %c0_i32_0 : i32
    scf.if %2 {
      %cst_8 = arith.constant 0.000000e+00 : f32
      %11 = vector.broadcast %cst_8 : f32 to vector<8x8xf32>
      %c0_9 = arith.constant 0 : index
      %c0_10 = arith.constant 0 : index
      %12 = vector.load %arg2[%c0_9, %c0_10] : memref<8x8xf32, #tpu.memory_space<vmem>>, vector<8x8xf32>
      tpu.vector_store %arg2[%c0_9, %c0_10], %11 {strides = array<i32>} : memref<8x8xf32, #tpu.memory_space<vmem>>, vector<8x8xf32>,
    } else {
    }
    %c0 = arith.constant 0 : index
    %c0_1 = arith.constant 0 : index
    %3 = vector.load %arg1[%c0, %c0_1] : memref<8x256xf32, #tpu.memory_space<vmem>>, vector<8x256xf32>
    %c0_2 = arith.constant 0 : index
    %c0_3 = arith.constant 0 : index
    %4 = vector.load %arg2[%c0_2, %c0_3] : memref<8x8xf32, #tpu.memory_space<vmem>>, vector<8x8xf32>
    %cst = arith.constant dense<0.000000e+00> : vector<8x8xf32>
    %5 = tpu.matmul %3, %3, %cst {dimension_numbers = #tpu.dot_dimension_numbers<[1], [1], [0], [0], [0, 0, 1, 0], [], []>} : vector<8x256xf32>, vector<8x256xf32>, vector<8x8xf32> -> vector<8x8xf32>
    %6 = arith.addf %4, %5 : vector<8x8xf32>
    %c0_4 = arith.constant 0 : index
    %c0_5 = arith.constant 0 : index
    %7 = vector.load %arg2[%c0_4, %c0_5] : memref<8x8xf32, #tpu.memory_space<vmem>>, vector<8x8xf32>
    tpu.vector_store %arg2[%c0_4, %c0_5], %6 {strides = array<i32>} : memref<8x8xf32, #tpu.memory_space<vmem>>, vector<8x8xf32>,
    %c0_i32_6 = arith.constant 0 : i32
    %8 = arith.cmpi eq, %arg0, %c0_i32_6 : i32
    %9 = arith.extui %8 : i1 to i32
    %c0_i32_7 = arith.constant 0 : i32
    %10 = arith.cmpi ne, %9, %c0_i32_7 : i32
    scf.if %10 {
      %c0_8 = arith.constant 0 : index
      %c0_9 = arith.constant 0 : index
      %11 = vector.load %arg2[%c0_8, %c0_9] : memref<8x8xf32, #tpu.memory_space<vmem>>, vector<8x8xf32>
      %cst_10 = arith.constant 4.8828125E-4 : f32
      %12 = vector.broadcast %cst_10 : f32 to vector<8x8xf32>
      %13 = arith.mulf %11, %12 : vector<8x8xf32>
      %c0_11 = arith.constant 0 : index
      %c0_12 = arith.constant 0 : index
      %14 = vector.load %arg2[%c0_11, %c0_12] : memref<8x8xf32, #tpu.memory_space<vmem>>, vector<8x8xf32>
      tpu.vector_store %arg2[%c0_11, %c0_12], %13 {strides = array<i32>} : memref<8x8xf32, #tpu.memory_space<vmem>>, vector<8x8xf32>,
    } else {
    }
    return
  }
  func.func @transform_0(%arg0: i32) -> (i32, i32) {
    %c0_i32 = arith.constant 0 : i32
    %c0_i32_0 = arith.constant 0 : i32
    return %c0_i32, %arg0 : i32, i32
  }
  func.func @transform_1(%arg0: i32) -> (i32, i32) {
    %c0_i32 = arith.constant 0 : i32
    %c0_i32_0 = arith.constant 0 : i32
    %c0_i32_1 = arith.constant 0 : i32
    return %c0_i32, %c0_i32_0 : i32, i32
  }
}

</mosaic_0001>

<bundles_post_ra>
// kernel: tpu_custom_call.1
= control target key start
LH: loop header
LB: loop body
LE: loop exit
PB: predicated region body
PF: predicated region fallthrough
CT: control target
= control target key end

     0   :  { %6 = vsyncpa [#allocation3], 0  ;;  %s193_s0 = inlined_call_operand.hbm [shape: f32[8,256], index: 0, kind: input, shape index: {}]   ;;  %s194_s1 = inlined_call_operand.hbm [shape: f32[8,8], index: 1, kind: output, shape index: {}]  }
   0x1   :  { %7 = vsyncpa [#allocation4], 0  ;;  %s171_s6 = smov [#allocation2]  }
   0x2   :  { %s14_s7 = sshll.u32 %s171_s6, 4  ;;  %s15_s7 = int_to_ptr.vmem [resolvable:$true] %s14_s7 }
   0x3   :  { %s135_s8 = scalar_lea.vmem %s15_s7, 256  ;;  %p140_p1 = scmp.lt.s32.totalorder %s15_s7, %s15_s7 }
   0x4   :  { %p136_p0 = scmp.ne.s32.totalorder %s15_s7, %s135_s8  ;;  %p141_p2 = scmp.lt.s32.totalorder %s135_s8, %s135_s8 }
   0x6   :  { %p142_p3 = por %p141_p2, %p140_p1 }
   0x8   :  { %p143_p4 = pnand %p142_p3, %p136_p0 }
   0xa   :  { %146 = shalt.err (!%p143_p4)
}
   0xb   :  { %17 = dma.hbm_to_vmem [thread:$0]  %s193_s0, 256, %s15_s7, [#allocation3]  }
   0xc   :  { %167 = dma.done.wait [#allocation3], 256  }
   0xd   :  { %168 = vsyncadd [#allocation3], 4294967040  ;;  %vm25_vm0 = vcmask 64512   ;;  %v172_v0 = vmov 0.0   ;;  %v28_v1 = vld [vmem:[#allocation2 + $0x8] sm:$0xff]  ;;  %v27_v2 = vld [vmem:[#allocation2] sm:$0xff] }
   0xe   :  { %26 = vst.msk [vmem:[#allocation5] sm:$0xff] %vm25_vm0, %v172_v0  ;;  %60 = vmatprep.subr.mxu0 %v28_v1  ;;  %94 = vmatprep.mubr.f32.mxu0 %v28_v1  ;;  %s173_s11 = smov [#allocation5]  }
   0xf   :  { %61 = vmatpush1.xpose.msra.mxu0 %v27_v2  ;;  %s115_s0 = sshll.u32 %s173_s11, 4  ;;  %s116_s0 = int_to_ptr.vmem [resolvable:$true] %s115_s0 }
  0x10   :  { %s147_s12 = scalar_lea.vmem %s116_s0, 128  ;;  %p152_p6 = scmp.lt.s32.totalorder %s116_s0, %s116_s0 }
  0x11   :  { %p148_p5 = scmp.ne.s32.totalorder %s116_s0, %s147_s12  ;;  %p153_p7 = scmp.lt.s32.totalorder %s147_s12, %s147_s12 }
  0x12   :  { %95 = vmatmul.mubr.f32.vlgmr.msra.gmra.mxu0 %v27_v2 }
  0x13   :  { %p154_p8 = por %p153_p7, %p152_p6 }
  0x15   :  { %v29_v3 = vld [vmem:[#allocation5] sm:$0xff]  ;;  %p155_p9 = pnand %p154_p8, %p148_p5 }
  0xd2   :  { %v96_v4 = vpop.f32.mrf.mxu0 }
  0xd3   :  { %v100_v5 = vadd.f32 %v96_v4, %v29_v3 }
  0xd4   :  { %v98_v6 = vpop.f32.mrf.mxu0 }
  0xd5   :  { %102 = vst.msk [vmem:[#allocation5] sm:$0xff] %vm25_vm0, %v100_v5 }
  0xdc   :  { %v106_v7 = vld [vmem:[#allocation5] sm:$0xff] }
  0xdd   :  { %v107_v8 = vmul.f32 0.00048828125, %v106_v7 }
  0xdf   :  { %108 = vst.msk [vmem:[#allocation5] sm:$0xff] %vm25_vm0, %v107_v8 }
  0xe0   :  { %158 = shalt.err (!%p155_p9)
}
  0xe1   :  { %118 = dma.vmem_to_hbm [thread:$0]  %s116_s0, 128, %s194_s1, [#allocation4]  }
  0xe2   :  { %169 = dma.done.wait [#allocation4], 128  }
  0xe3   :  { %170 = vsyncadd [#allocation4], 4294967168 }
  0xe4   :  { %122 = vsyncpa [#allocation3], 1 }
  0xe5   :  { %123 = vsyncpa [#allocation4], 1 }

</bundles_post_ra>
